<compile_context>
chip_gen: v5e
topology: v5e:2x2
jax: 0.10.0
libtpu: 0.0.40
codegen_flags: <defaults>
</compile_context>

<pallas_src>
import jax
import jax.numpy as jnp
from jax.experimental import pallas as pl
from jax.experimental.pallas import tpu as pltpu

_LANES = 128


def _make_kernel(scl: float, inv_scl: float):
    def kernel(x_ref, o_ref):
        # Upcast to f32 for the math: matches the fp32 reference module for
        # low-precision storage dtypes at zero HBM cost (kernel is mem-bound).
        # jnp.tanh lowers to the single EUP transcendental; the two muls ride
        # the VPU slot, so the kernel sits at the HBM roofline.
        # TODO(synk): on v7x, confirm via pl.lower_as_mlir / bundle dump that
        # tanh stays a single EUP op (no polynomial expansion).
        xf = x_ref[...].astype(jnp.float32)
        o_ref[...] = (scl * jnp.tanh(xf * inv_scl)).astype(o_ref.dtype)

    return kernel


def _tpu_generation() -> int:
    """Best-effort TPU generation from the device kind string (5/6/7)."""
    kind = ""
    try:
        kind = jax.devices()[0].device_kind.lower()
    except Exception:
        pass
    for gen in (7, 6, 5, 4):
        if str(gen) in kind:
            return gen
    return 6  # conservative default


def _gen_config(gen: int):
    # block_bytes: per-array tile size target.
    # min_steps:  minimum grid length once the tensor exceeds one block
    #             (pipeline overlap; 2x per-core depth on dual-TC v7x).
    # vmem_limit: explicit scoped-VMEM budget (2 arrays x 2 buffers x block
    #             plus headroom); <= 48 MiB so it also fits v7x's 64 MiB.
    if gen >= 7:
        return dict(block_bytes=8 << 20, min_steps=6, vmem_limit=48 << 20)
    if gen == 6:
        return dict(block_bytes=4 << 20, min_steps=3, vmem_limit=48 << 20)
    # v5e: default scoped limit is only 16 MiB -> raise it explicitly.
    return dict(block_bytes=2 << 20, min_steps=3, vmem_limit=32 << 20)


def lat_act_tanh(x, scl=1.0, *, block_bytes=None, donate_input=False):
    """Elementwise y = scl * tanh(x / scl), matching LatActTanh.forward.

    Notes:
      * scl == 0 is a division by zero in the reference module too; rejected.
      * Math is done in f32 in-register; x * (1/scl) is used instead of x/scl
        (not bit-identical to a true divide, well below activation noise).
      * donate_input aliases the pallas_call operand; whether the caller's
        buffer is actually donated depends on XLA's reshape aliasing.
    """
    if scl == 0:
        raise ValueError("scl must be non-zero (same hazard as the PyTorch module).")
    scl_f = float(scl)
    inv_scl = 1.0 / scl_f  # reciprocal computed once, in full precision

    orig_shape = x.shape
    dtype = x.dtype
    n = x.size
    itemsize = jnp.dtype(dtype).itemsize

    gen = _tpu_generation()
    cfg = _gen_config(gen)
    if block_bytes is None:
        block_bytes = cfg["block_bytes"]

    # dtype-native sublane tile: 8 rows for 4-byte, 16 for 2-byte, 32 for 1-byte.
    sub = max(8, 32 // itemsize)
    chunk = _LANES * sub  # elements per fully-aligned row group

    n_main = (n // chunk) * chunk
    if n_main == 0:
        # Less than one aligned row group: not worth a kernel launch.
        return (scl_f * jnp.tanh(x.astype(jnp.float32) * inv_scl)).astype(dtype)

    flat = x.reshape(-1)
    tail_n = n - n_main
    main_flat = flat[:n_main] if tail_n else flat
    rows = n_main // _LANES  # multiple of `sub` by construction
    x2d = main_flat.reshape(rows, _LANES)

    # --- Tile selection -----------------------------------------------------
    total_bytes = n_main * itemsize
    target_tr = max(sub, (block_bytes // (_LANES * itemsize)) // sub * sub)
    if total_bytes <= block_bytes:
        tr = rows  # whole tensor in one block: no forced splitting
    else:
        cap_tr = max(sub, (rows // cfg["min_steps"]) // sub * sub)
        tr = max(sub, min(target_tr, cap_tr))
    tr = min(tr, rows)
    grid = (pl.cdiv(rows, tr),)  # ragged last block handled by Pallas masking

    # VMEM budget: in + out, double-buffered, plus headroom; cap for v7x.
    vmem_need = 4 * tr * _LANES * itemsize + (2 << 20)
    vmem_cap = (48 << 20) if gen >= 7 else (100 << 20)
    vmem_limit = min(max(cfg["vmem_limit"], vmem_need), vmem_cap)

    # TODO(synk): on v7x, profile-check that both TensorCores receive grid
    # blocks under "parallel"; if one TC idles, switch to pltpu.CORE_PARALLEL.
    out2d = pl.pallas_call(
        _make_kernel(scl_f, inv_scl),
        out_shape=jax.ShapeDtypeStruct((rows, _LANES), dtype),
        grid_spec=pl.GridSpec(
            grid=grid,
            in_specs=[pl.BlockSpec((tr, _LANES), lambda i: (i, 0))],
            out_specs=pl.BlockSpec((tr, _LANES), lambda i: (i, 0)),
        ),
        compiler_params=pltpu.CompilerParams(
            dimension_semantics=("parallel",),
            vmem_limit_bytes=int(vmem_limit),
        ),
        cost_estimate=pl.CostEstimate(
            flops=2 * n_main,
            transcendentals=n_main,
            bytes_accessed=2 * n_main * itemsize,
        ),
        input_output_aliases=({0: 0} if donate_input else {}),
    )(x2d)

    out_main = out2d.reshape(-1)
    if tail_n:
        tail = flat[n_main:]
        out_tail = (scl_f * jnp.tanh(tail.astype(jnp.float32) * inv_scl)).astype(dtype)
        return jnp.concatenate([out_main, out_tail]).reshape(orig_shape)
    return out_main.reshape(orig_shape)


if __name__ == "__main__":
    key = jax.random.PRNGKey(0)
    # Small NCHW input consistent with a conv-style latent activation.
    x = jax.random.normal(key, (2, 4, 16, 16), dtype=jnp.float32) * 3.0
    scl = 1.5

    y = jax.block_until_ready(lat_act_tanh(x, scl=scl))
    y_ref = scl * jnp.tanh(x / scl)
    assert y.shape == x.shape and y.dtype == x.dtype
    assert jnp.max(jnp.abs(y - y_ref)) < 1e-5

    # Ragged (non-1024-aligned) path: aligned-prefix kernel + jnp tail.
    x2 = jax.random.normal(jax.random.PRNGKey(1), (3, 5, 17, 19), dtype=jnp.float32)
    y2 = jax.block_until_ready(lat_act_tanh(x2, scl=0.7))
    y2_ref = 0.7 * jnp.tanh(x2 / 0.7)
    assert y2.shape == x2.shape and jnp.max(jnp.abs(y2 - y2_ref)) < 1e-5

    # bf16 path: dtype-aware sublane tiling (16-row groups), f32 in-kernel math.
    x3 = (jax.random.normal(jax.random.PRNGKey(2), (2, 4, 16, 16), dtype=jnp.float32) * 3.0
          ).astype(jnp.bfloat16)
    y3 = jax.block_until_ready(lat_act_tanh(x3, scl=scl))
    y3_ref = (scl * jnp.tanh(x3.astype(jnp.float32) / scl)).astype(jnp.bfloat16)
    assert y3.shape == x3.shape and y3.dtype == jnp.bfloat16
    assert jnp.max(jnp.abs(y3.astype(jnp.float32) - y3_ref.astype(jnp.float32))) < 3e-2

    print("KERNEL_OK")
</pallas_src>

<mosaic_0001>
module attributes {stable_mosaic.version = 11 : i64} {
  func.func @kernel(%arg0: i32, %arg1: memref<16x128xf32, #tpu.memory_space<vmem>>, %arg2: memref<16x128xf32, #tpu.memory_space<vmem>>) attributes {dimension_semantics = [#tpu.dimension_semantics<parallel>], iteration_bounds = array<i64: 1>, scalar_prefetch = 0 : i64, scratch_operands = 0 : i64, tpu.core_type = #tpu.core_type<tc>, window_params = [{transform_indices = @transform_0, window_bounds = array<i64: 16, 128>}, {transform_indices = @transform_1, window_bounds = array<i64: 16, 128>}]} {
    %c0 = arith.constant 0 : index
    %c0_0 = arith.constant 0 : index
    %0 = vector.load %arg1[%c0, %c0_0] : memref<16x128xf32, #tpu.memory_space<vmem>>, vector<16x128xf32>
    %cst = arith.constant 0.666666686 : f32
    %1 = vector.broadcast %cst : f32 to vector<16x128xf32>
    %2 = arith.mulf %0, %1 : vector<16x128xf32>
    %3 = math.tanh %2 : vector<16x128xf32>
    %cst_1 = arith.constant 1.500000e+00 : f32
    %4 = vector.broadcast %cst_1 : f32 to vector<16x128xf32>
    %5 = arith.mulf %4, %3 : vector<16x128xf32>
    %c0_2 = arith.constant 0 : index
    %c0_3 = arith.constant 0 : index
    %6 = vector.load %arg2[%c0_2, %c0_3] : memref<16x128xf32, #tpu.memory_space<vmem>>, vector<16x128xf32>
    tpu.vector_store %arg2[%c0_2, %c0_3], %5 {strides = array<i32>} : memref<16x128xf32, #tpu.memory_space<vmem>>, vector<16x128xf32>,
    return
  }
  func.func @transform_0(%arg0: i32) -> (i32, i32) {
    %c0_i32 = arith.constant 0 : i32
    %c0_i32_0 = arith.constant 0 : i32
    return %arg0, %c0_i32 : i32, i32
  }
  func.func @transform_1(%arg0: i32) -> (i32, i32) {
    %c0_i32 = arith.constant 0 : i32
    %c0_i32_0 = arith.constant 0 : i32
    return %arg0, %c0_i32 : i32, i32
  }
}

</mosaic_0001>

<bundles_post_ra>
// kernel: tpu_custom_call.1
= control target key start
LH: loop header
LB: loop body
LE: loop exit
PB: predicated region body
PF: predicated region fallthrough
CT: control target
= control target key end

     0   :  { %6 = vsyncpa [#allocation3], 0  ;;  %s134_s0 = inlined_call_operand.hbm [shape: f32[16,128], index: 0, kind: input, shape index: {}]   ;;  %s135_s1 = inlined_call_operand.hbm [shape: f32[16,128], index: 1, kind: output, shape index: {}]  }
   0x1   :  { %7 = vsyncpa [#allocation4], 0  ;;  %s12_s8 = sshll.u32 %s134_s0, 4  ;;  %s114_s9 = smov [#allocation2]   ;;  %s13_s8 = int_to_ptr.hbm [resolvable:$true] %s12_s8 }
   0x2   :  { %s14_s10 = sshll.u32 %s114_s9, 4  ;;  %s115_s11 = smov 128   ;;  %s15_s10 = int_to_ptr.vmem [resolvable:$true] %s14_s10 }
   0x3   :  { %s116_s12 = smov 8  }
   0x4   :  { %20 = dma.hbm_to_vmem [thread:$0]  %s13_s8, 256, %s15_s10, [#allocation3], %s115_s11, %s115_s11, %s116_s12  }
   0x5   :  { %110 = dma.done.wait [#allocation3], 256  }
   0x6   :  { %111 = vsyncadd [#allocation3], 4294967040  ;;  %v25_v0 = vld [vmem:[#allocation2] sm:$0xff]  ;;  %v26_v1 = vld [vmem:[#allocation2 + $0x8] sm:$0xff]  ;;  %s117_s13 = smov [#allocation5]   ;;  %s41_s0 = sshll.u32 %s135_s1, 4  ;;  %s42_s0 = int_to_ptr.hbm [resolvable:$true] %s41_s0 }
   0x7   :  { %v27_v2 = vmul.f32 0.6666667, %v25_v0  ;;  %v28_v3 = vmul.f32 0.6666667, %v26_v1  ;;  %s39_s14 = sshll.u32 %s117_s13, 4  ;;  %s40_s14 = int_to_ptr.vmem [resolvable:$true] %s39_s14 }
   0x9   :  { %58 = vtanh.f32 %v27_v2 }
   0xa   :  { %60 = vtanh.f32 %v28_v3 }
   0xf   :  { %v59_v4 = vpop.eup %58 }
  0x10   :  { %v61_v5 = vpop.eup %60  ;;  %v31_v6 = vmul.f32 1.5, %v59_v4 }
  0x11   :  { %v32_v7 = vmul.f32 1.5, %v61_v5 }
  0x12   :  { %33 = vst [vmem:[#allocation5] sm:$0xff] %v31_v6 }
  0x13   :  { %34 = vst [vmem:[#allocation5 + $0x8] sm:$0xff] %v32_v7 }
  0x14   :  { %47 = dma.vmem_to_hbm [thread:$0]  %s40_s14, 256, %s42_s0, [#allocation4], %s115_s11, %s115_s11, %s116_s12  }
  0x15   :  { %112 = dma.done.wait [#allocation4], 256  }
  0x16   :  { %113 = vsyncadd [#allocation4], 4294967040 }
  0x17   :  { %52 = vsyncpa [#allocation3], 1 }
  0x18   :  { %53 = vsyncpa [#allocation4], 1 }

</bundles_post_ra>
